<compile_context>
chip_gen: v5e
topology: v5e:2x2
jax: 0.10.0
libtpu: 0.0.40
codegen_flags: <defaults>
</compile_context>

<pallas_src>
import functools

import jax
import jax.numpy as jnp
from jax import lax
from jax.experimental import pallas as pl
from jax.experimental.pallas import tpu as pltpu


# ----------------------------- Pallas kernel ---------------------------------

def _backbone_kernel(xc_ref, cw_ref, cb_ref, fw_ref, fb_ref, o_ref, pool_ref,
                     *, inv_hw):
    """Fused conv-as-packed-matmul(+bias,ReLU) -> GAP partial-sum -> (finalize) FC.

    xc_ref: (1, tp, K)   bf16  im2col pixel tile (K = 9*Cin, packed in wrapper)
    cw_ref: (K, Cout)    bf16  conv weights, (tap, cin)-major rows
    cb_ref: (1, Cout)    f32
    fw_ref: (Cout, D)    bf16
    fb_ref: (1, D)       f32
    o_ref:  (1, 1, D)    f32   embedding row for this batch element
    pool_ref: (1, Cout)  f32   GAP accumulator (persists across pixel tiles)
    """
    t = pl.program_id(1)

    @pl.when(t == 0)
    def _init():
        pool_ref[...] = jnp.zeros_like(pool_ref)

    # Single K=9*Cin matmul on the MXU (f32 accumulation). No per-tap slices,
    # no relayout copies, one push per tile instead of nine.
    acc = jnp.dot(xc_ref[0], cw_ref[...],
                  preferred_element_type=jnp.float32)          # (tp, Cout) f32
    act = jnp.maximum(acc + cb_ref[...], 0.0)                  # bias + ReLU
    pool_ref[...] += jnp.sum(act, axis=0, keepdims=True)       # GAP partial sum

    @pl.when(t == pl.num_programs(1) - 1)
    def _finalize():
        pooled = (pool_ref[...] * inv_hw).astype(jnp.bfloat16)  # (1, Cout)
        o_ref[0] = jnp.dot(pooled, fw_ref[...],
                           preferred_element_type=jnp.float32) + fb_ref[...]


# ------------------------------ JAX wrappers ----------------------------------

def _choose_pixel_tile(P, max_pixels):
    """Largest pixel-tile that divides P, is sublane-friendly, and fits the budget."""
    if P <= max_pixels:
        return P
    for tp in range(min(max_pixels, P), 15, -1):
        if P % tp == 0 and tp % 16 == 0:
            return tp
    for tp in range(min(max_pixels, P), 7, -1):
        if P % tp == 0 and tp % 8 == 0:
            return tp
    return P  # graceful fallback: single full-extent tile (always a legal block)


def _vmem_limit_bytes(tp, cout, d):
    # Per-step footprint: bf16 input tile (K lane-padded to 128, double-buffered),
    # f32 matmul result + ReLU temp, resident weights, plus headroom.  Clamped to
    # 32 MiB, which is within the scoped budget on v5e/v6e/v7x alike.
    in_buf = tp * 128 * 2 * 2
    act = tp * cout * 4 * 2
    weights = 2 * (128 * cout * 2 + cout * 4 + cout * d * 2 + d * 4)
    est = in_buf + act + weights + (2 << 20)
    return int(min(max(est, 16 << 20), 32 << 20))


def backbone(params, img_nchw, pixel_tile=None):
    """image (B, Cin, H, W) -> embedding (B, D) via one fused Pallas call."""
    x = jnp.transpose(img_nchw, (0, 2, 3, 1))                  # NCHW -> NHWC
    B, H, W, Cin = x.shape
    Cout = params["conv_w"].shape[-1]
    D = params["fc_w"].shape[-1]
    K = 9 * Cin
    P = H * W

    # im2col packed once in the wrapper (bf16): streamed operand has a 9x denser
    # minor dim than raw NHWC (27 vs 3 lanes of 128) and the kernel does a single
    # packed matmul instead of nine K=3 matmuls with relayout copies.
    xp = jnp.pad(x, ((0, 0), (1, 1), (1, 1), (0, 0)))          # (B, H+2, W+2, Cin)
    taps = [xp[:, kh:kh + H, kw:kw + W, :] for kh in range(3) for kw in range(3)]
    xcol = jnp.concatenate(taps, axis=-1).reshape(B, P, K).astype(jnp.bfloat16)

    # Default budget targets a ~6 MiB f32 activation tile (total per-step footprint
    # stays under the 32 MiB scoped-VMEM ceiling on every generation).
    tp = pixel_tile if pixel_tile is not None else _choose_pixel_tile(
        P, max(16, (6 << 20) // (Cout * 4)))
    assert P % tp == 0
    nT = P // tp

    cw = params["conv_w"].reshape(K, Cout).astype(jnp.bfloat16)  # (tap,cin)-major
    cb = params["conv_b"].reshape(1, Cout).astype(jnp.float32)
    fw = params["fc_w"].astype(jnp.bfloat16)
    fb = params["fc_b"].reshape(1, D).astype(jnp.float32)

    kernel = functools.partial(_backbone_kernel, inv_hw=1.0 / float(P))

    emb = pl.pallas_call(
        kernel,
        out_shape=jax.ShapeDtypeStruct((B, 1, D), jnp.float32),
        grid_spec=pltpu.PrefetchScalarGridSpec(
            num_scalar_prefetch=0,
            grid=(B, nT),                    # reduction (pixel-tile) axis last
            in_specs=[
                pl.BlockSpec((1, tp, K), lambda b, t: (b, t, 0)),
                pl.BlockSpec((K, Cout), lambda b, t: (0, 0)),
                pl.BlockSpec((1, Cout), lambda b, t: (0, 0)),
                pl.BlockSpec((Cout, D), lambda b, t: (0, 0)),
                pl.BlockSpec((1, D), lambda b, t: (0, 0)),
            ],
            out_specs=pl.BlockSpec((1, 1, D), lambda b, t: (b, 0, 0)),
            scratch_shapes=[pltpu.VMEM((1, Cout), jnp.float32)],
        ),
        compiler_params=pltpu.CompilerParams(
            dimension_semantics=("parallel", "arbitrary"),
            vmem_limit_bytes=_vmem_limit_bytes(tp, Cout, D)),
    )(xcol, cw, cb, fw, fb)
    return emb.reshape(B, D)


def inv_cosine_similarity(e1, e2):
    # 1 - cosine_similarity(normalize(e1), normalize(e2)).  Plain jnp per review:
    # a dedicated pallas_call + HBM round-trip costs more than this fused reduce.
    assert e1.ndim == 2 and e2.ndim == 2 and e1.shape[0] == e2.shape[0]
    inv1 = lax.rsqrt(jnp.maximum(jnp.sum(e1 * e1, axis=1, keepdims=True), 1e-24))
    inv2 = lax.rsqrt(jnp.maximum(jnp.sum(e2 * e2, axis=1, keepdims=True), 1e-24))
    cos = jnp.sum(e1 * e2, axis=1) * (inv1 * inv2)[:, 0]
    return 1.0 - cos


def init_params(key, cin=3, c1=128, d=128):
    # Lane-dense channel / embedding dims (multiples of 128).
    k1, k2, k3, k4 = jax.random.split(key, 4)
    return {
        "conv_w": 0.1 * jax.random.normal(k1, (3, 3, cin, c1), jnp.float32),
        "conv_b": 0.1 * jax.random.normal(k2, (c1,), jnp.float32),
        "fc_w":   0.1 * jax.random.normal(k3, (c1, d), jnp.float32),
        "fc_b":   0.1 * jax.random.normal(k4, (d,), jnp.float32),
    }


def cnn_forward(params, img1, img2=None, pixel_tile=None):
    """Mirror of CNN.forward: embedding if img2 is None, else inv-cosine similarity."""
    if img2 is None:
        return backbone(params, img1, pixel_tile=pixel_tile)
    # Fused siamese branches: one backbone launch over the concatenated batch
    # (2B elements -> even split across v7x's two TensorCores on the parallel axis).
    B = img1.shape[0]
    emb = backbone(params, jnp.concatenate([img1, img2], axis=0),
                   pixel_tile=pixel_tile)
    e1, e2 = emb[:B], emb[B:]
    assert e1.shape == e2.shape
    return inv_cosine_similarity(e1, e2)


# ---------------------------------- main --------------------------------------

if __name__ == "__main__":
    key = jax.random.PRNGKey(0)
    kp, k1, k2 = jax.random.split(key, 3)
    params = init_params(kp)
    img1 = jax.random.normal(k1, (2, 3, 16, 16), jnp.float32)
    img2 = jax.random.normal(k2, (2, 3, 16, 16), jnp.float32)

    fwd = jax.jit(cnn_forward, static_argnames=("pixel_tile",))
    sim = fwd(params, img1, img2)                       # siamese branch -> (B,)
    emb = fwd(params, img1)                             # single-image branch -> (B, D)
    sim_tiled = fwd(params, img1, img2, pixel_tile=64)  # exercise multi-tile GAP path
    jax.block_until_ready((sim, emb, sim_tiled))

    # pure-JAX reference check
    def ref_backbone(p, img):
        out = lax.conv_general_dilated(
            img, jnp.transpose(p["conv_w"], (3, 2, 0, 1)),    # HWIO -> OIHW
            window_strides=(1, 1), padding="SAME",
            dimension_numbers=("NCHW", "OIHW", "NCHW"))
        out = jnp.maximum(out + p["conv_b"][None, :, None, None], 0.0)
        pooled = jnp.mean(out, axis=(2, 3))
        return pooled @ p["fc_w"] + p["fc_b"]

    r1 = ref_backbone(params, img1)
    r2 = ref_backbone(params, img2)
    n1 = r1 / jnp.linalg.norm(r1, axis=1, keepdims=True)
    n2 = r2 / jnp.linalg.norm(r2, axis=1, keepdims=True)
    ref_sim = 1.0 - jnp.sum(n1 * n2, axis=1)

    assert emb.shape == (2, 128) and sim.shape == (2,)
    assert jnp.allclose(emb, r1, atol=2e-2), "embedding mismatch"
    assert jnp.allclose(sim, ref_sim, atol=2e-2), "similarity mismatch"
    assert jnp.allclose(sim_tiled, ref_sim, atol=2e-2), "tiled similarity mismatch"
    print("KERNEL_OK")
</pallas_src>

<mosaic_0001>
module attributes {stable_mosaic.version = 11 : i64} {
  func.func @_backbone_kernel(%arg0: i32, %arg1: i32, %arg2: memref<1x256x27xbf16, #tpu.memory_space<vmem>>, %arg3: memref<27x128xbf16, #tpu.memory_space<vmem>>, %arg4: memref<1x128xf32, #tpu.memory_space<vmem>>, %arg5: memref<128x128xbf16, #tpu.memory_space<vmem>>, %arg6: memref<1x128xf32, #tpu.memory_space<vmem>>, %arg7: memref<1x1x128xf32, #tpu.memory_space<vmem>>, %arg8: memref<1x128xf32, #tpu.memory_space<vmem>>) attributes {dimension_semantics = [#tpu.dimension_semantics<parallel>, #tpu.dimension_semantics<arbitrary>], iteration_bounds = array<i64: 4, 1>, scalar_prefetch = 0 : i64, scratch_operands = 1 : i64, tpu.core_type = #tpu.core_type<tc>, window_params = [{transform_indices = @transform_0, window_bounds = array<i64: 1, 256, 27>}, {pipeline_mode = #tpu.pipeline_mode<synchronous>, transform_indices = @transform_1, window_bounds = array<i64: 27, 128>}, {pipeline_mode = #tpu.pipeline_mode<synchronous>, transform_indices = @transform_2, window_bounds = array<i64: 1, 128>}, {pipeline_mode = #tpu.pipeline_mode<synchronous>, transform_indices = @transform_3, window_bounds = array<i64: 128, 128>}, {pipeline_mode = #tpu.pipeline_mode<synchronous>, transform_indices = @transform_4, window_bounds = array<i64: 1, 128>}, {transform_indices = @transform_5, window_bounds = array<i64: 1, 1, 128>}]} {
    %c0_i32 = arith.constant 0 : i32
    %0 = arith.cmpi eq, %arg1, %c0_i32 : i32
    %1 = arith.extui %0 : i1 to i32
    %c0_i32_0 = arith.constant 0 : i32
    %2 = arith.cmpi ne, %1, %c0_i32_0 : i32
    scf.if %2 {
      %cst_15 = arith.constant 0.000000e+00 : f32
      %20 = vector.broadcast %cst_15 : f32 to vector<1x128xf32>
      %c0_16 = arith.constant 0 : index
      %c0_17 = arith.constant 0 : index
      %21 = vector.load %arg8[%c0_16, %c0_17] : memref<1x128xf32, #tpu.memory_space<vmem>>, vector<1x128xf32>
      tpu.vector_store %arg8[%c0_16, %c0_17], %20 {strides = array<i32>} : memref<1x128xf32, #tpu.memory_space<vmem>>, vector<1x128xf32>,
    } else {
    }
    %c0 = arith.constant 0 : index
    %c0_1 = arith.constant 0 : index
    %c0_2 = arith.constant 0 : index
    %3 = vector.load %arg2[%c0, %c0_1, %c0_2] : memref<1x256x27xbf16, #tpu.memory_space<vmem>>, vector<1x256x27xbf16>
    %4 = vector.shape_cast %3 : vector<1x256x27xbf16> to vector<256x27xbf16>
    %c0_3 = arith.constant 0 : index
    %c0_4 = arith.constant 0 : index
    %5 = vector.load %arg3[%c0_3, %c0_4] : memref<27x128xbf16, #tpu.memory_space<vmem>>, vector<27x128xbf16>
    %cst = arith.constant dense<0.000000e+00> : vector<256x128xf32>
    %6 = tpu.matmul %4, %5, %cst {dimension_numbers = #tpu.dot_dimension_numbers<[1], [0], [0], [1], [0, 0, 1, 1], [], []>} : vector<256x27xbf16>, vector<27x128xbf16>, vector<256x128xf32> -> vector<256x128xf32>
    %c0_5 = arith.constant 0 : index
    %c0_6 = arith.constant 0 : index
    %7 = vector.load %arg4[%c0_5, %c0_6] : memref<1x128xf32, #tpu.memory_space<vmem>>, vector<1x128xf32>
    %8 = vector.broadcast %7 : vector<1x128xf32> to vector<256x128xf32>
    %9 = arith.addf %6, %8 : vector<256x128xf32>
    %cst_7 = arith.constant 0.000000e+00 : f32
    %10 = vector.broadcast %cst_7 : f32 to vector<256x128xf32>
    %11 = arith.maximumf %9, %10 : vector<256x128xf32>
    %c0_8 = arith.constant 0 : index
    %c0_9 = arith.constant 0 : index
    %12 = vector.load %arg8[%c0_8, %c0_9] : memref<1x128xf32, #tpu.memory_space<vmem>>, vector<1x128xf32>
    %cst_10 = arith.constant dense<0.000000e+00> : vector<128xf32>
    %13 = vector.multi_reduction <add>, %11, %cst_10 [0] : vector<256x128xf32> to vector<128xf32>
    %14 = vector.shape_cast %13 : vector<128xf32> to vector<1x128xf32>
    %15 = arith.addf %12, %14 : vector<1x128xf32>
    %c0_11 = arith.constant 0 : index
    %c0_12 = arith.constant 0 : index
    %16 = vector.load %arg8[%c0_11, %c0_12] : memref<1x128xf32, #tpu.memory_space<vmem>>, vector<1x128xf32>
    tpu.vector_store %arg8[%c0_11, %c0_12], %15 {strides = array<i32>} : memref<1x128xf32, #tpu.memory_space<vmem>>, vector<1x128xf32>,
    %c0_i32_13 = arith.constant 0 : i32
    %17 = arith.cmpi eq, %arg1, %c0_i32_13 : i32
    %18 = arith.extui %17 : i1 to i32
    %c0_i32_14 = arith.constant 0 : i32
    %19 = arith.cmpi ne, %18, %c0_i32_14 : i32
    scf.if %19 {
      %c0_15 = arith.constant 0 : index
      %c0_16 = arith.constant 0 : index
      %20 = vector.load %arg8[%c0_15, %c0_16] : memref<1x128xf32, #tpu.memory_space<vmem>>, vector<1x128xf32>
      %cst_17 = arith.constant 3.906250e-03 : f32
      %21 = vector.broadcast %cst_17 : f32 to vector<1x128xf32>
      %22 = arith.mulf %20, %21 : vector<1x128xf32>
      %23 = arith.truncf %22 : vector<1x128xf32> to vector<1x128xbf16>
      %c0_18 = arith.constant 0 : index
      %c0_19 = arith.constant 0 : index
      %24 = vector.load %arg5[%c0_18, %c0_19] : memref<128x128xbf16, #tpu.memory_space<vmem>>, vector<128x128xbf16>
      %cst_20 = arith.constant dense<0.000000e+00> : vector<1x128xf32>
      %25 = tpu.matmul %23, %24, %cst_20 {dimension_numbers = #tpu.dot_dimension_numbers<[1], [0], [0], [1], [0, 0, 1, 1], [], []>} : vector<1x128xbf16>, vector<128x128xbf16>, vector<1x128xf32> -> vector<1x128xf32>
      %c0_21 = arith.constant 0 : index
      %c0_22 = arith.constant 0 : index
      %26 = vector.load %arg6[%c0_21, %c0_22] : memref<1x128xf32, #tpu.memory_space<vmem>>, vector<1x128xf32>
      %27 = arith.addf %25, %26 : vector<1x128xf32>
      %c0_23 = arith.constant 0 : index
      %c0_24 = arith.constant 0 : index
      %c0_25 = arith.constant 0 : index
      %28 = vector.load %arg7[%c0_23, %c0_24, %c0_25] : memref<1x1x128xf32, #tpu.memory_space<vmem>>, vector<1x1x128xf32>
      %29 = vector.shape_cast %28 : vector<1x1x128xf32> to vector<1x128xf32>
      %30 = vector.shape_cast %27 : vector<1x128xf32> to vector<1x1x128xf32>
      tpu.vector_store %arg7[%c0_23, %c0_24, %c0_25], %30 {strides = array<i32>} : memref<1x1x128xf32, #tpu.memory_space<vmem>>, vector<1x1x128xf32>,
    } else {
    }
    return
  }
  func.func @transform_0(%arg0: i32, %arg1: i32) -> (i32, i32, i32) {
    %c0_i32 = arith.constant 0 : i32
    %c0_i32_0 = arith.constant 0 : i32
    return %arg0, %arg1, %c0_i32 : i32, i32, i32
  }
  func.func @transform_1(%arg0: i32, %arg1: i32) -> (i32, i32) {
    %c0_i32 = arith.constant 0 : i32
    %c0_i32_0 = arith.constant 0 : i32
    %c0_i32_1 = arith.constant 0 : i32
    return %c0_i32, %c0_i32_0 : i32, i32
  }
  func.func @transform_2(%arg0: i32, %arg1: i32) -> (i32, i32) {
    %c0_i32 = arith.constant 0 : i32
    %c0_i32_0 = arith.constant 0 : i32
    %c0_i32_1 = arith.constant 0 : i32
    return %c0_i32, %c0_i32_0 : i32, i32
  }
  func.func @transform_3(%arg0: i32, %arg1: i32) -> (i32, i32) {
    %c0_i32 = arith.constant 0 : i32
    %c0_i32_0 = arith.constant 0 : i32
    %c0_i32_1 = arith.constant 0 : i32
    return %c0_i32, %c0_i32_0 : i32, i32
  }
  func.func @transform_4(%arg0: i32, %arg1: i32) -> (i32, i32) {
    %c0_i32 = arith.constant 0 : i32
    %c0_i32_0 = arith.constant 0 : i32
    %c0_i32_1 = arith.constant 0 : i32
    return %c0_i32, %c0_i32_0 : i32, i32
  }
  func.func @transform_5(%arg0: i32, %arg1: i32) -> (i32, i32, i32) {
    %c0_i32 = arith.constant 0 : i32
    %c0_i32_0 = arith.constant 0 : i32
    %c0_i32_1 = arith.constant 0 : i32
    return %arg0, %c0_i32, %c0_i32_0 : i32, i32, i32
  }
}

</mosaic_0001>

<bundles_post_ra>
// kernel: cnn_forward.1
= control target key start
LH: loop header
LB: loop body
LE: loop exit
PB: predicated region body
PF: predicated region fallthrough
CT: control target
= control target key end

     0   :  { %s992_s18 = smov 0   ;;  %s994_s19 = smov 0   ;;  %s1160_s0 = inlined_call_operand.vmem [shape: bf16[4,256,27], index: 0, kind: input, shape index: {}]   ;;  %s1161_s1 = inlined_call_operand.vmem [shape: bf16[27,128], index: 1, kind: input, shape index: {}]   ;;  %s1162_s2 = inlined_call_operand.vmem [shape: f32[1,128], index: 2, kind: input, shape index: {}]   ;;  %s1163_s3 = inlined_call_operand.vmem [shape: bf16[128,128], index: 3, kind: input, shape index: {}]   ;;  %s1164_s4 = inlined_call_operand.vmem [shape: f32[1,128], index: 4, kind: input, shape index: {}]   ;;  %s1165_s5 = inlined_call_operand.vmem [shape: f32[4,1,128], index: 5, kind: output, shape index: {}]  }
   0x1   :  { %s996_s20 = smov 0  }
   0x2 LB: > { %s27_s21 = sadd.s32 1, %s954_s19  ;;  %p753_p0 = scmp.ge.s32.totalorder %s958_s20, 1  ;;  %s958_s20 = sphi %s996_s20, %s15_s20   ;;  %s954_s19 = sphi %s994_s19, %s1167_s19   ;;  %s950_s18 = sphi %s992_s18, %s1166_s18  }
   0x3   : > { %p29_p1 = scmp.ge.s32.totalorder %s27_s21, 4  ;;  %p206_p2 = scmp.lt.s32.totalorder %s958_s20, 5 }
   0x5   : > { %s1169_s21 = smov (%p29_p1, %s27_s21), 0  ;;  %p207_p3 = pnand %p753_p0, %p206_p2 }
   0x6   : > { %p237_p4 = scmp.lt.s32.totalorder (!%p207_p3), %s950_s18, 3 }
   0x7   : > { %210 = sbr.rel (%p207_p3) target bundleno = 433 (0x1b1), region = 40 }
   0xc   : > { %v826_v0 = vld [vmem:[%s1161_s1 + $0x8] sm:$0xf]  ;;  %v896_v1 = vld [vmem:[%s1161_s1 + $0x8] sm:$0x30]  ;;  %vm435_vm0 = vcmask 1044480   ;;  %vm436_vm1 = vcmask 1045504  }
   0xd   : > { %v827_v2 = vor.u32 %v896_v1, %v826_v0  ;;  %v960_v3 = vmov 65535   ;;  %s1171_s18 = smov (!%p237_p4, %s950_s18), 3  ;;  %v895_v7 = vld [vmem:[%s1161_s1] sm:$0xff]  ;;  %vm386_vm2 = vcmask 220160  }
   0xe   : > { %v437_v4 = vsel %vm435_vm0, 4294967295, %v960_v3  ;;  %s878_s26 = sshll.u32 %s1171_s18, 7  ;;  %v1072_v42 = vld [vmem:[%s1162_s2] ss:$0 sm:$0xff]  ;;  %s248_s8 = scalar_lea.vmem %s1165_s5, %s1171_s18 }
   0xf   : > { %v438_v5 = vsel %vm436_vm1, %v437_v4, 0  ;;  %s1025_s6 = scalar_lea.vmem %s1160_s0, %s878_s26 }
  0x10   : > { %v440_v6 = vand.u32 %v827_v2, %v438_v5  ;;  %v879_v8 = vld [vmem:[%s1025_s6] sm:$0xff]  ;;  %v884_v9 = vld [vmem:[%s1025_s6 + $0x28] sm:$0xff]  ;;  %v889_v10 = vld [vmem:[%s1025_s6 + $0x50] sm:$0xff] }
  0x11   : > { %v880_v11 = vld [vmem:[%s1025_s6 + $0x8] sm:$0xff]  ;;  %v885_v12 = vld [vmem:[%s1025_s6 + $0x30] sm:$0xff]  ;;  %v890_v13 = vld [vmem:[%s1025_s6 + $0x58] sm:$0xff] }
  0x12   : > { %448 = vmatpush.bf16.msra.mxu0 %v440_v6  ;;  %905 = vmatpush.bf16.msra.mxu2 %v440_v6  ;;  %v881_v14 = vld [vmem:[%s1025_s6 + $0x10] sm:$0xff]  ;;  %v886_v15 = vld [vmem:[%s1025_s6 + $0x38] sm:$0xff]  ;;  %v891_v16 = vld [vmem:[%s1025_s6 + $0x60] sm:$0xff] }
  0x13   : > { %906 = vmatpush.bf16.msra.mxu3 %v440_v6  ;;  %v882_v17 = vld [vmem:[%s1025_s6 + $0x18] sm:$0xff]  ;;  %v887_v18 = vld [vmem:[%s1025_s6 + $0x40] sm:$0xff]  ;;  %v892_v19 = vld [vmem:[%s1025_s6 + $0x68] sm:$0xff] }
  0x14   : > { %v883_v20 = vld [vmem:[%s1025_s6 + $0x20] sm:$0xff]  ;;  %v888_v21 = vld [vmem:[%s1025_s6 + $0x48] sm:$0xff]  ;;  %v893_v22 = vld [vmem:[%s1025_s6 + $0x70] sm:$0xff] }
  0x15   : > { %v894_v23 = vld [vmem:[%s1025_s6 + $0x78] sm:$0xff] }
  0x16   : > { %449 = vmatpush.bf16.msra.mxu0 %v895_v7  ;;  %907 = vmatpush.bf16.msra.mxu2 %v895_v7 }
  0x17   : > { %908 = vmatpush.bf16.msra.mxu3 %v895_v7 }
  0x19   : > { %828 = vmatmul.msk.bf16.vlgmr.msra.gmra.mxu0 %vm386_vm2, %v879_v8  ;;  %833 = vmatmul.msk.bf16.vlgmr.msra.gmra.mxu2 %vm386_vm2, %v884_v9 }
  0x1a   : > { %838 = vmatmul.msk.bf16.vlgmr.msra.gmra.mxu3 %vm386_vm2, %v889_v10 }
  0x29   : > { %829 = vmatmul.msk.bf16.gmra.mxu0 %vm386_vm2, %v880_v11  ;;  %834 = vmatmul.msk.bf16.gmra.mxu2 %vm386_vm2, %v885_v12 }
  0x2a   : > { %839 = vmatmul.msk.bf16.gmra.mxu3 %vm386_vm2, %v890_v13 }
  0x39   : > { %830 = vmatmul.msk.bf16.gmra.mxu0 %vm386_vm2, %v881_v14  ;;  %835 = vmatmul.msk.bf16.gmra.mxu2 %vm386_vm2, %v886_v15 }
  0x3a   : > { %840 = vmatmul.msk.bf16.gmra.mxu3 %vm386_vm2, %v891_v16 }
  0x49   : > { %831 = vmatmul.msk.bf16.gmra.mxu0 %vm386_vm2, %v882_v17  ;;  %836 = vmatmul.msk.bf16.gmra.mxu2 %vm386_vm2, %v887_v18 }
  0x4a   : > { %841 = vmatmul.msk.bf16.gmra.mxu3 %vm386_vm2, %v892_v19 }
  0x59   : > { %832 = vmatmul.msk.bf16.gmra.mxu0 %vm386_vm2, %v883_v20  ;;  %837 = vmatmul.msk.bf16.gmra.mxu2 %vm386_vm2, %v888_v21 }
  0x5a   : > { %842 = vmatmul.msk.bf16.gmra.mxu3 %vm386_vm2, %v893_v22 }
  0x6a   : > { %843 = vmatmul.msk.bf16.gmra.mxu3 %vm386_vm2, %v894_v23 }
  0x96   : > { %v451_v24 = vpop.f32.mrf.mxu0 }
  0x97   : > { %v452_v45 = vadd.f32 %v1072_v42, %v451_v24 }
  0x99   : > { %v531_v51 = vmax.f32 %v452_v45, 0.0 }
  0x9c   : > { %v476_v25 = vpop.f32.mrf.mxu2 }
  0x9d   : > { %v1059_v26 = vpop.f32.mrf.mxu3  ;;  %v477_v11 = vadd.f32 %v1072_v42, %v476_v25 }
  0x9e   : > { %v453_v27 = vpop.f32.mrf.mxu0 }
  0x9f   : > { %v454_v44 = vadd.f32 %v1072_v42, %v453_v27  ;;  %v541_v17 = vmax.f32 %v477_v11, 0.0 }
  0xa1   : > { %v532_v48 = vmax.f32 %v454_v44, 0.0 }
  0xa3   : > { %v564_v54 = vadd.f32 %v532_v48, %v531_v51 }
  0xa4   : > { %v478_v28 = vpop.f32.mrf.mxu2 }
  0xa5   : > { %v1061_v29 = vpop.f32.mrf.mxu3  ;;  %v479_v14 = vadd.f32 %v1072_v42, %v478_v28 }
  0xa6   : > { %v456_v30 = vpop.f32.mrf.mxu0 }
  0xa7   : > { %v457_v46 = vadd.f32 %v1072_v42, %v456_v30  ;;  %v542_v21 = vmax.f32 %v479_v14, 0.0 }
  0xa9   : > { %v533_v52 = vmax.f32 %v457_v46, 0.0 }
  0xab   : > { %v565_v58 = vadd.f32 %v564_v54, %v533_v52 }
  0xac   : > { %v481_v31 = vpop.f32.mrf.mxu2 }
  0xad   : > { %v1063_v32 = vpop.f32.mrf.mxu3  ;;  %v482_v18 = vadd.f32 %v1072_v42, %v481_v31 }
  0xae   : > { %v458_v33 = vpop.f32.mrf.mxu0 }
  0xaf   : > { %v459_v49 = vadd.f32 %v1072_v42, %v458_v33  ;;  %v543_v24 = vmax.f32 %v482_v18, 0.0 }
  0xb1   : > { %v534_v55 = vmax.f32 %v459_v49, 0.0 }
  0xb3   : > { %v566_v62 = vadd.f32 %v565_v58, %v534_v55  ;;  %v902_v55 = vld [vmem:[%s1163_s3 + $0x28] sm:$0xff] }
  0xb4   : > { %v483_v34 = vpop.f32.mrf.mxu2 }
  0xb5   : > { %v1065_v36 = vpop.f32.mrf.mxu3  ;;  %v484_v22 = vadd.f32 %v1072_v42, %v483_v34 }
  0xb6   : > { %v461_v35 = vpop.f32.mrf.mxu0 }
  0xb7   : > { %v462_v53 = vadd.f32 %v1072_v42, %v461_v35  ;;  %v544_v33 = vmax.f32 %v484_v22, 0.0 }
  0xb9   : > { %v535_v59 = vmax.f32 %v462_v53, 0.0 }
  0xbb   : > { %v567_v1 = vadd.f32 %v566_v62, %v535_v59 }
  0xbc   : > { %v486_v37 = vpop.f32.mrf.mxu2 }
  0xbd   : > { %v1067_v39 = vpop.f32.mrf.mxu3  ;;  %v487_v27 = vadd.f32 %v1072_v42, %v486_v37 }
  0xbe   : > { %v463_v38 = vpop.f32.mrf.mxu0 }
  0xbf   : > { %v464_v56 = vadd.f32 %v1072_v42, %v463_v38  ;;  %v904_v38 = vld [vmem:[%s1163_s3 + $0x38] sm:$0xff]  ;;  %v545_v31 = vmax.f32 %v487_v27, 0.0 }
  0xc0   : > { %674 = vmatpush.bf16.msra.mxu1 %v904_v38 }
  0xc1   : > { %v536_v63 = vmax.f32 %v464_v56, 0.0  ;;  %v502_v56 = vadd.f32 %v1072_v42, %v1059_v26  ;;  %v509_v26 = vadd.f32 %v1072_v42, %v1065_v36  ;;  %v899_v36 = vld [vmem:[%s1163_s3 + $0x10] sm:$0xff] }
  0xc3   : > { %v568_v5 = vadd.f32 %v567_v1, %v536_v63  ;;  %v901_v63 = vld [vmem:[%s1163_s3 + $0x20] sm:$0xff]  ;;  %v507_v1 = vadd.f32 %v1072_v42, %v1063_v32 }
  0xc4   : > { %v488_v41 = vpop.f32.mrf.mxu2 }
  0xc5   : > { %v1074_v43 = vpop.f32.mrf.mxu3  ;;  %v489_v35 = vadd.f32 %v1072_v42, %v488_v41  ;;  %v903_v41 = vld [vmem:[%s1163_s3 + $0x30] sm:$0xff] }
  0xc6   : > { %v466_v40 = vpop.f32.mrf.mxu0  ;;  %675 = vmatpush.bf16.msra.mxu1 %v903_v41  ;;  %v514_v32 = vadd.f32 %v1072_v42, %v1074_v43 }
  0xc7   : > { %v467_v60 = vadd.f32 %v1072_v42, %v466_v40  ;;  %v546_v34 = vmax.f32 %v489_v35, 0.0 }
  0xc9   : > { %v537_v2 = vmax.f32 %v467_v60, 0.0  ;;  %v504_v60 = vadd.f32 %v1072_v42, %v1061_v29  ;;  %v900_v29 = vld [vmem:[%s1163_s3 + $0x18] sm:$0xff] }
  0xca   : > { %676 = vmatpush.bf16.msra.mxu1 %v902_v55 }
  0xcb   : > { %v569_v7 = vadd.f32 %v568_v5, %v537_v2  ;;  %v553_v5 = vmax.f32 %v507_v1, 0.0 }
  0xcc   : > { %v491_v50 = vpop.f32.mrf.mxu2 }
  0xcd   : > { %v1082_v57 = vpop.f32.mrf.mxu3  ;;  %v492_v40 = vadd.f32 %v1072_v42, %v491_v50 }
  0xce   : > { %v468_v47 = vpop.f32.mrf.mxu0  ;;  %677 = vmatpush.bf16.msra.mxu1 %v901_v63 }
  0xcf   : > { %v469_v0 = vadd.f32 %v1072_v42, %v468_v47  ;;  %v961_v47 = vmov 0.0   ;;  %v547_v48 = vmax.f32 %v492_v40, 0.0 }
  0xd0   : > { %254 = vst [vmem:[#allocation2] sm:$0x1] %v961_v47 }
  0xd1   : > { %v538_v6 = vmax.f32 %v469_v0, 0.0  ;;  %v551_v0 = vmax.f32 %v502_v56, 0.0 }
  0xd2   : > { %678 = vmatpush.bf16.msra.mxu1 %v900_v29 }
  0xd3   : > { %v570_v12 = vadd.f32 %v569_v7, %v538_v6  ;;  %v512_v6 = vadd.f32 %v1072_v42, %v1067_v39  ;;  %v898_v39 = vld [vmem:[%s1163_s3 + $0x8] sm:$0xff] }
  0xd4   : > { %v493_v4 = vpop.f32.mrf.mxu2 }
  0xd5   : > { %v1087_v10 = vpop.f32.mrf.mxu3  ;;  %v494_v45 = vadd.f32 %v1072_v42, %v493_v4 }
  0xd6   : > { %v471_v61 = vpop.f32.mrf.mxu0  ;;  %679 = vmatpush.bf16.msra.mxu1 %v899_v36 }
  0xd7   : > { %v472_v3 = vadd.f32 %v1072_v42, %v471_v61  ;;  %v548_v52 = vmax.f32 %v494_v45, 0.0  ;;  %v563_v47 = vld [vmem:[#allocation2] sm:$0x1] }
  0xd9   : > { %v539_v8 = vmax.f32 %v472_v3, 0.0  ;;  %v552_v3 = vmax.f32 %v504_v60, 0.0 }
  0xda   : > { %680 = vmatpush.bf16.msra.mxu1 %v898_v39 }
  0xdb   : > { %v571_v15 = vadd.f32 %v570_v12, %v539_v8  ;;  %v555_v12 = vmax.f32 %v512_v6, 0.0 }
  0xdc   : > { %v496_v20 = vpop.f32.mrf.mxu2 }
  0xdd   : > { %v521_v30 = vpop.f32.mrf.mxu3  ;;  %v497_v49 = vadd.f32 %v1072_v42, %v496_v20 }
  0xde   : > { %v473_v9 = vpop.f32.mrf.mxu0  ;;  %v522_v18 = vadd.f32 %v1072_v42, %v521_v30 }
  0xdf   : > { %v474_v13 = vadd.f32 %v1072_v42, %v473_v9  ;;  %v549_v58 = vmax.f32 %v497_v49, 0.0  ;;  %v554_v9 = vmax.f32 %v509_v26, 0.0 }
  0xe1   : > { %v540_v16 = vmax.f32 %v474_v13, 0.0  ;;  %v517_v13 = vadd.f32 %v1072_v42, %v1082_v57  ;;  %v897_v57 = vld [vmem:[%s1163_s3] sm:$0xff] }
  0xe2   : > { %681 = vmatpush.bf16.msra.mxu1 %v897_v57 }
  0xe3   : > { %v572_v19 = vadd.f32 %v571_v15, %v540_v16  ;;  %v556_v15 = vmax.f32 %v514_v32, 0.0  ;;  %v519_v16 = vadd.f32 %v1072_v42, %v1087_v10 }
  0xe4   : > { %v498_v37 = vpop.f32.mrf.mxu2 }
  0xe5   : > { %v573_v23 = vadd.f32 %v572_v19, %v541_v17  ;;  %v499_v53 = vadd.f32 %v1072_v42, %v498_v37  ;;  %v523_v54 = vpop.f32.mrf.mxu3  ;;  %v557_v17 = vmax.f32 %v517_v13, 0.0  ;;  %v558_v20 = vmax.f32 %v519_v16, 0.0 }
  0xe6   : > { %v524_v22 = vadd.f32 %v1072_v42, %v523_v54 }
  0xe7   : > { %v574_v25 = vadd.f32 %v573_v23, %v542_v21  ;;  %v550_v62 = vmax.f32 %v499_v53, 0.0 }
  0xe9   : > { %v575_v28 = vadd.f32 %v574_v25, %v543_v24  ;;  %v559_v24 = vmax.f32 %v522_v18, 0.0 }
  0xeb   : > { %v576_v44 = vadd.f32 %v575_v28, %v544_v33  ;;  %v560_v33 = vmax.f32 %v524_v22, 0.0 }
  0xed   : > { %v577_v46 = vadd.f32 %v576_v44, %v545_v31  ;;  %v526_v8 = vpop.f32.mrf.mxu3 }
  0xee   : > { %v527_v25 = vadd.f32 %v1072_v42, %v526_v8 }
  0xef   : > { %v578_v51 = vadd.f32 %v577_v46, %v546_v34 }
  0xf0   : > { %v561_v28 = vmax.f32 %v527_v25, 0.0 }
  0xf1   : > { %v579_v50 = vadd.f32 %v578_v51, %v547_v48 }
  0xf3   : > { %v580_v59 = vadd.f32 %v579_v50, %v548_v52 }
  0xf5   : > { %v581_v61 = vadd.f32 %v580_v59, %v549_v58  ;;  %v528_v23 = vpop.f32.mrf.mxu3 }
  0xf6   : > { %v529_v30 = vadd.f32 %v1072_v42, %v528_v23  ;;  %v625_v42 = vld [vmem:[%s1164_s4] sm:$0x1] }
  0xf7   : > { %v582_v2 = vadd.f32 %v581_v61, %v550_v62 }
  0xf8   : > { %v562_v31 = vmax.f32 %v529_v30, 0.0 }
  0xf9   : > { %v583_v4 = vadd.f32 %v582_v2, %v551_v0 }
  0xfb   : > { %v584_v7 = vadd.f32 %v583_v4, %v552_v3 }
  0xfd   : > { %v585_v11 = vadd.f32 %v584_v7, %v553_v5 }
  0xff   : > { %v586_v14 = vadd.f32 %v585_v11, %v554_v9 }
 0x101   : > { %v587_v43 = vadd.f32 %v586_v14, %v555_v12 }
 0x103   : > { %v588_v19 = vadd.f32 %v587_v43, %v556_v15 }
 0x105   : > { %v589_v21 = vadd.f32 %v588_v19, %v557_v17 }
 0x107   : > { %v590_v27 = vadd.f32 %v589_v21, %v558_v20 }
 0x109   : > { %v591_v10 = vadd.f32 %v590_v27, %v559_v24 }
 0x10b   : > { %v592_v35 = vadd.f32 %v591_v10, %v560_v33 }
 0x10d   : > { %v593_v38 = vadd.f32 %v592_v35, %v561_v28 }
 0x10f   : > { %v594_v40 = vadd.f32 %v593_v38, %v562_v31 }
 0x111   : > { %v595_v44 = vrot.slane %v594_v40, 4 }
 0x113   : > { %v596_v34 = vadd.f32 %v595_v44, %v594_v40 }
 0x115   : > { %v597_v45 = vrot.slane %v596_v34, 2 }
 0x117   : > { %v598_v46 = vadd.f32 %v597_v45, %v596_v34 }
 0x119   : > { %v599_v37 = vrot.slane %v598_v46, 1 }
 0x11b   : > { %v600_v41 = vadd.f32 %v599_v37, %v598_v46 }
 0x11d   : > { %v601_v48 = vadd.f32 %v600_v41, %v563_v47 }
 0x11f   : > { %602 = vst [vmem:[#allocation2] sm:$0x1] %v601_v48 }
 0x126   : > { %v606_v49 = vld [vmem:[#allocation2] sm:$0x1] }
 0x127   : > { %v607_v51 = vmul.f32 0.00390625, %v606_v49 }
 0x129   : > { %v608_v52 = vpack.c.bf16 %v607_v51, %v607_v51 }
 0x12b   : > { %682 = vmatmul.bf16.vlgmr.msra.gmra.mxu1 %v608_v52 }
 0x1a8   : > { %v683_v50 = vpop.f32.mrf.mxu1 }
 0x1a9   : > { %v684_v53 = vadd.f32 %v683_v50, %v625_v42 }
 0x1ab   : > { %687 = vst [vmem:[%s248_s8] sm:$0x1] %v684_v53 }
 0x1b0   : > { %v685_v54 = vpop.f32.mrf.mxu1 }
 0x1b1 PF: > { %s15_s20 = sadd.s32 1, %s958_s20   ;;  %s1166_s18 = smov %s954_s19 }
 0x1b2   : > { %p12_p5 = scmp.ge.s32.totalorder %s15_s20, 6   ;;  %s1167_s19 = smov %s1169_s21 }
 0x1b4   :  { %14 = sbr.rel (!%p12_p5) target bundleno = 2 (0x2), region = 78 }

</bundles_post_ra>
